<compile_context>
chip_gen: v5e
topology: v5e:2x2
jax: 0.10.0
libtpu: 0.0.40
codegen_flags: <defaults>
</compile_context>

<pallas_src>
import functools

import jax
import jax.numpy as jnp
import numpy as np
from jax.experimental import pallas as pl
from jax.experimental.pallas import tpu as pltpu

KERNEL_SIZES = (3, 5, 7, 11)   # MaskConV1d kernel sizes in OperationSet[1:]


# ----------------------------------------------------------------------------
# OperationSet[0]: Zero()  -- no kernel: a fill has zero read traffic.
# ----------------------------------------------------------------------------
def zero_op(x):
    return jnp.zeros_like(x)


# ----------------------------------------------------------------------------
# OperationSet[1..4]: MaskConV1d(dim_model, dim_model, k) -- causal Conv1d
# ----------------------------------------------------------------------------
def _masked_conv1d_kernel(x_ref, w_ref, b_ref, o_ref, halo_ref, *,
                          k, bt, ts, d, carry_halo, use_concat):
    """One (batch-tile, seq-tile) block of the causal Conv1d.

    x_ref   : [bt, ts, d]        x.dtype (f32 in the example)
    w_ref   : [k*d, d]           bf16 (tap-stacked, pre-transposed Conv1d W)
    b_ref   : [1, d]             f32
    o_ref   : [bt, ts, d]        x.dtype
    halo_ref: [bt, k-1, d]       bf16 scratch -- causal halo carried across
                                  seq tiles (zeroed at the first seq tile).
    """
    si = pl.program_id(1)
    kh = k - 1

    @pl.when(si == 0)
    def _():
        halo_ref[...] = jnp.zeros_like(halo_ref)   # causal left padding

    xb = x_ref[...].astype(jnp.bfloat16)                   # cast ONCE
    xp = jnp.concatenate([halo_ref[...], xb], axis=1)      # [bt, kh+ts, d]

    if use_concat:
        # Small D: fuse all taps into one lane-dense MXU matmul (K = k*d).
        xcat = jnp.concatenate([xp[:, j:j + ts, :] for j in range(k)], axis=-1)
        y = jnp.einsum('bsf,fd->bsd', xcat, w_ref[...],
                       preferred_element_type=jnp.float32)
    else:
        # D >= MXU K: k accumulating per-tap dots; no [*, k*d] materialization.
        y = jnp.zeros((bt, ts, d), jnp.float32)
        for j in range(k):
            y = y + jnp.einsum('bsf,fd->bsd', xp[:, j:j + ts, :],
                               w_ref[j * d:(j + 1) * d, :],
                               preferred_element_type=jnp.float32)

    o_ref[...] = (y + b_ref[...].reshape(1, 1, d)).astype(o_ref.dtype)

    if carry_halo:
        # Carry the last k-1 rows of this tile into the next seq tile.
        halo_ref[...] = xb[:, ts - kh:, :]


def prepare_conv_params(conv_weights, conv_biases):
    """Init-time weight prep (hoisted off the per-call hot path).

    PyTorch Conv1d weight [out, in, k] -> tap-stacked [k*in, out] in bf16,
    bias -> [1, out] f32.  Returns a list of (w_stack, bias2d, k).
    """
    prepared = []
    for w, b in zip(conv_weights, conv_biases):
        k = w.shape[-1]
        w_stack = jnp.concatenate([w[:, :, j].T for j in range(k)], axis=0)
        prepared.append((w_stack.astype(jnp.bfloat16),
                         b.astype(jnp.float32)[None, :], k))
    return prepared


def masked_conv1d_pallas(x, w_stack, b2, k):
    """Causal Conv1d over the seq axis.  x: [B, S, D]; w_stack: [k*D, D] bf16."""
    B, S, D = x.shape
    kh = k - 1

    # ---- tile selection (toy shapes resolve to a single block) -------------
    tS = S
    if S > 512:
        for cand in range(512, 0, -8):          # sublane-aligned divisors of S
            if S % cand == 0 and cand >= kh:
                tS = cand
                break
    nS = S // tS
    bt = 1
    for cand in range(B, 0, -1):                # fold batch into matmul M dim
        if B % cand == 0 and cand * tS <= 1024:
            bt = cand
            break
    nB = B // bt
    carry_halo = nS > 1                         # tS >= kh guaranteed when True
    use_concat = D < 128                        # lane-concat only for small D

    kernel = functools.partial(
        _masked_conv1d_kernel, k=k, bt=bt, ts=tS, d=D,
        carry_halo=carry_halo, use_concat=use_concat)

    return pl.pallas_call(
        kernel,
        out_shape=jax.ShapeDtypeStruct((B, S, D), x.dtype),
        grid=(nB, nS),
        in_specs=[
            pl.BlockSpec((bt, tS, D), lambda bi, si: (bi, si, 0)),   # x tile
            pl.BlockSpec((k * D, D), lambda bi, si: (0, 0)),         # stacked W
            pl.BlockSpec((1, D), lambda bi, si: (0, 0)),             # bias
        ],
        out_specs=pl.BlockSpec((bt, tS, D), lambda bi, si: (bi, si, 0)),
        scratch_shapes=[pltpu.VMEM((bt, kh, D), jnp.bfloat16)],      # halo carry
        compiler_params=pltpu.CompilerParams(
            # batch tiles independent -> parallel (megacore); seq tiles carry
            # the causal halo in scratch -> must stay sequential.
            dimension_semantics=("parallel", "arbitrary")),
    )(x, w_stack, b2)


# ----------------------------------------------------------------------------
# MixedOpLocal.forward (eval)
# ----------------------------------------------------------------------------
def mixed_op_local(x, prepared_convs, nas_coding=None):
    """x: [B, S, dim_model].  nas_coding is a static (host) int, as in PyTorch."""
    num_ops = 1 + len(prepared_convs)
    if nas_coding is None:
        # PyTorch fallback draws on the host; under jit this is baked in.
        nas_coding = int(np.random.choice(num_ops))
    if nas_coding == 0:
        return zero_op(x)
    w_stack, b2, k = prepared_convs[nas_coding - 1]
    return masked_conv1d_pallas(x, w_stack, b2, k)


# ----------------------------------------------------------------------------
# Pure-JAX f32 reference (mirrors the PyTorch eval forward)
# ----------------------------------------------------------------------------
def reference_mixed_op(x, conv_weights, conv_biases, nas_coding):
    if nas_coding == 0:
        return jnp.zeros_like(x)
    w = conv_weights[nas_coding - 1]
    b = conv_biases[nas_coding - 1]
    k = w.shape[-1]
    B, S, D = x.shape
    xp = jnp.pad(x, ((0, 0), (k - 1, 0), (0, 0)))
    acc = jnp.zeros((B, S, D), jnp.float32)
    for j in range(k):
        acc = acc + jnp.einsum('bsd,ed->bse', xp[:, j:j + S, :], w[:, :, j])
    return acc + b[None, None, :]


if __name__ == "__main__":
    B, S, D = 2, 8, 32                     # batch, seq, dim_model
    key = jax.random.PRNGKey(0)
    keys = jax.random.split(key, 1 + 2 * len(KERNEL_SIZES))
    x = jax.random.normal(keys[0], (B, S, D), jnp.float32)

    conv_weights, conv_biases = [], []
    for i, k in enumerate(KERNEL_SIZES):
        w = 0.1 * jax.random.normal(keys[1 + 2 * i], (D, D, k), jnp.float32)  # Conv1d [out,in,k]
        b = 0.1 * jax.random.normal(keys[2 + 2 * i], (D,), jnp.float32)
        conv_weights.append(w)
        conv_biases.append(b)

    # Weight prep happens ONCE (init time), not per forward call.
    prepared_convs = prepare_conv_params(conv_weights, conv_biases)

    # Exercise every NAS branch (Zero + the four masked convs) deterministically.
    for nas in range(1 + len(KERNEL_SIZES)):
        out = jax.block_until_ready(mixed_op_local(x, prepared_convs, nas))
        ref = jax.block_until_ready(reference_mixed_op(x, conv_weights, conv_biases, nas))
        # Tolerance covers bf16 rounding of the MXU operands (accumulation is f32).
        np.testing.assert_allclose(np.asarray(out), np.asarray(ref),
                                   rtol=3e-2, atol=3e-2)
        assert out.shape == x.shape
        assert out.dtype == x.dtype

    print("KERNEL_OK")
</pallas_src>

<mosaic_0001>
module attributes {stable_mosaic.version = 11 : i64} {
  func.func @_masked_conv1d_kernel(%arg0: i32, %arg1: i32, %arg2: memref<2x8x32xf32, #tpu.memory_space<vmem>>, %arg3: memref<96x32xbf16, #tpu.memory_space<vmem>>, %arg4: memref<1x32xf32, #tpu.memory_space<vmem>>, %arg5: memref<2x8x32xf32, #tpu.memory_space<vmem>>, %arg6: memref<2x2x32xbf16, #tpu.memory_space<vmem>>) attributes {dimension_semantics = [#tpu.dimension_semantics<parallel>, #tpu.dimension_semantics<arbitrary>], iteration_bounds = array<i64: 1, 1>, scalar_prefetch = 0 : i64, scratch_operands = 1 : i64, tpu.core_type = #tpu.core_type<tc>, window_params = [{transform_indices = @transform_0, window_bounds = array<i64: 2, 8, 32>}, {pipeline_mode = #tpu.pipeline_mode<synchronous>, transform_indices = @transform_1, window_bounds = array<i64: 96, 32>}, {pipeline_mode = #tpu.pipeline_mode<synchronous>, transform_indices = @transform_2, window_bounds = array<i64: 1, 32>}, {transform_indices = @transform_3, window_bounds = array<i64: 2, 8, 32>}]} {
    %c0_i32 = arith.constant 0 : i32
    %0 = arith.cmpi eq, %arg1, %c0_i32 : i32
    %1 = arith.extui %0 : i1 to i32
    %c0_i32_0 = arith.constant 0 : i32
    %2 = arith.cmpi ne, %1, %c0_i32_0 : i32
    scf.if %2 {
      %cst_13 = arith.constant 0.000000e+00 : bf16
      %18 = vector.broadcast %cst_13 : bf16 to vector<2x2x32xbf16>
      %c0_14 = arith.constant 0 : index
      %c0_15 = arith.constant 0 : index
      %c0_16 = arith.constant 0 : index
      %19 = vector.load %arg6[%c0_14, %c0_15, %c0_16] : memref<2x2x32xbf16, #tpu.memory_space<vmem>>, vector<2x2x32xbf16>
      tpu.vector_store %arg6[%c0_14, %c0_15, %c0_16], %18 {strides = array<i32>} : memref<2x2x32xbf16, #tpu.memory_space<vmem>>, vector<2x2x32xbf16>,
    } else {
    }
    %c0 = arith.constant 0 : index
    %c0_1 = arith.constant 0 : index
    %c0_2 = arith.constant 0 : index
    %3 = vector.load %arg2[%c0, %c0_1, %c0_2] : memref<2x8x32xf32, #tpu.memory_space<vmem>>, vector<2x8x32xf32>
    %4 = arith.truncf %3 : vector<2x8x32xf32> to vector<2x8x32xbf16>
    %c0_3 = arith.constant 0 : index
    %c0_4 = arith.constant 0 : index
    %c0_5 = arith.constant 0 : index
    %5 = vector.load %arg6[%c0_3, %c0_4, %c0_5] : memref<2x2x32xbf16, #tpu.memory_space<vmem>>, vector<2x2x32xbf16>
    %6 = tpu.concatenate %5, %4 in 1 : vector<2x2x32xbf16>, vector<2x8x32xbf16> -> vector<2x10x32xbf16>
    %7 = vector.extract_strided_slice %6 {offsets = [0, 0, 0], sizes = [2, 8, 32], strides = [1, 1, 1]} : vector<2x10x32xbf16> to vector<2x8x32xbf16>
    %8 = vector.extract_strided_slice %6 {offsets = [0, 1, 0], sizes = [2, 8, 32], strides = [1, 1, 1]} : vector<2x10x32xbf16> to vector<2x8x32xbf16>
    %9 = vector.extract_strided_slice %6 {offsets = [0, 2, 0], sizes = [2, 8, 32], strides = [1, 1, 1]} : vector<2x10x32xbf16> to vector<2x8x32xbf16>
    %10 = tpu.concatenate %7, %8, %9 in 2 : vector<2x8x32xbf16>, vector<2x8x32xbf16>, vector<2x8x32xbf16> -> vector<2x8x96xbf16>
    %c0_6 = arith.constant 0 : index
    %c0_7 = arith.constant 0 : index
    %11 = vector.load %arg3[%c0_6, %c0_7] : memref<96x32xbf16, #tpu.memory_space<vmem>>, vector<96x32xbf16>
    "tpu.trace_start"() <{level = 10 : i32, message = "bsf,fd->bsd"}> : () -> ()
    %cst = arith.constant dense<0.000000e+00> : vector<2x8x32xf32>
    %12 = tpu.matmul %10, %11, %cst {dimension_numbers = #tpu.dot_dimension_numbers<[2], [0], [0, 1], [1], [0, 0, 0, 1, 1, 1], [], []>} : vector<2x8x96xbf16>, vector<96x32xbf16>, vector<2x8x32xf32> -> vector<2x8x32xf32>
    "tpu.trace_stop"() : () -> ()
    %c0_8 = arith.constant 0 : index
    %c0_9 = arith.constant 0 : index
    %13 = vector.load %arg4[%c0_8, %c0_9] : memref<1x32xf32, #tpu.memory_space<vmem>>, vector<1x32xf32>
    %14 = vector.shape_cast %13 : vector<1x32xf32> to vector<1x1x32xf32>
    %15 = vector.broadcast %14 : vector<1x1x32xf32> to vector<2x8x32xf32>
    %16 = arith.addf %12, %15 : vector<2x8x32xf32>
    %c0_10 = arith.constant 0 : index
    %c0_11 = arith.constant 0 : index
    %c0_12 = arith.constant 0 : index
    %17 = vector.load %arg5[%c0_10, %c0_11, %c0_12] : memref<2x8x32xf32, #tpu.memory_space<vmem>>, vector<2x8x32xf32>
    tpu.vector_store %arg5[%c0_10, %c0_11, %c0_12], %16 {strides = array<i32>} : memref<2x8x32xf32, #tpu.memory_space<vmem>>, vector<2x8x32xf32>,
    return
  }
  func.func @transform_0(%arg0: i32, %arg1: i32) -> (i32, i32, i32) {
    %c0_i32 = arith.constant 0 : i32
    %c0_i32_0 = arith.constant 0 : i32
    return %arg0, %arg1, %c0_i32 : i32, i32, i32
  }
  func.func @transform_1(%arg0: i32, %arg1: i32) -> (i32, i32) {
    %c0_i32 = arith.constant 0 : i32
    %c0_i32_0 = arith.constant 0 : i32
    %c0_i32_1 = arith.constant 0 : i32
    return %c0_i32, %c0_i32_0 : i32, i32
  }
  func.func @transform_2(%arg0: i32, %arg1: i32) -> (i32, i32) {
    %c0_i32 = arith.constant 0 : i32
    %c0_i32_0 = arith.constant 0 : i32
    %c0_i32_1 = arith.constant 0 : i32
    return %c0_i32, %c0_i32_0 : i32, i32
  }
  func.func @transform_3(%arg0: i32, %arg1: i32) -> (i32, i32, i32) {
    %c0_i32 = arith.constant 0 : i32
    %c0_i32_0 = arith.constant 0 : i32
    return %arg0, %arg1, %c0_i32 : i32, i32, i32
  }
}

</mosaic_0001>

<bundles_post_ra>
// kernel: tpu_custom_call.1
= control target key start
LH: loop header
LB: loop body
LE: loop exit
PB: predicated region body
PF: predicated region fallthrough
CT: control target
= control target key end

     0   :  { %vm20_vm0 = vcmask 253952   ;;  %v237_v1 = vmov 0   ;;  %s297_s0 = inlined_call_operand.vmem [shape: f32[2,8,32], index: 0, kind: input, shape index: {}]   ;;  %s298_s1 = inlined_call_operand.vmem [shape: bf16[96,32], index: 1, kind: input, shape index: {}]   ;;  %s299_s2 = inlined_call_operand.vmem [shape: f32[1,32], index: 2, kind: input, shape index: {}]   ;;  %s300_s3 = inlined_call_operand.hbm [shape: f32[2,8,32], index: 3, kind: output, shape index: {}]  }
   0x1   :  { %v23_v0 = vld [vmem:[%s297_s0] sm:$0xff]  ;;  %21 = vst.msk [vmem:[#allocation2] sm:$0x1] %vm20_vm0, %v237_v1  ;;  %v24_v3 = vld [vmem:[%s297_s0 + $0x8] sm:$0xff] }
   0x2   :  { %v25_v2 = vpack.c.bf16 %v23_v0, %v23_v0  ;;  %v203_v4 = vld [vmem:[%s298_s1 + $0x28] sm:$0xff]  ;;  %22 = vst.msk [vmem:[#allocation2 + $0x1] sm:$0x1] %vm20_vm0, %v237_v1  ;;  %v26_v5 = vpack.c.bf16 %v24_v3, %v24_v3  ;;  %v202_v7 = vld [vmem:[%s298_s1 + $0x20] sm:$0xff] }
   0x3   :  { %141 = vmatpush.bf16.msra.mxu0 %v203_v4 }
   0x4   :  { %v31_v6 = vunpack.c.l.b16 %v25_v2 }
   0x5   :  { %8 = vsyncpa [#allocation4], 0  ;;  %v32_v8 = vunpack.c.l.b16 %v26_v5  ;;  %vm37_vm1 = vcmask 1040384   ;;  %v201_v12 = vld [vmem:[%s298_s1 + $0x18] sm:$0xff]  ;;  %s238_s21 = smov 64   ;;  %s239_s22 = smov 32  }
   0x6   :  { %v33_v9 = vpack.c.b16 %v31_v6, %v31_v6  ;;  %v200_v28 = vld [vmem:[%s298_s1 + $0x10] sm:$0xff]  ;;  %v199_v29 = vld [vmem:[%s298_s1 + $0x8] sm:$0xff]  ;;  %v198_v30 = vld [vmem:[%s298_s1] sm:$0xff]  ;;  %vm68_vm2 = vcmask 261120   ;;  %vm73_vm3 = vcmask 523264   ;;  %vm135_vm4 = vcmask 785408  }
   0x7   :  { %v34_v10 = vpack.c.b16 %v32_v8, %v32_v8  ;;  %142 = vmatpush.bf16.msra.mxu0 %v202_v7  ;;  %v210_v42 = vld [vmem:[%s299_s2] ss:$0 sm:$0xff]  ;;  %s240_s30 = smov [#allocation3]   ;;  %s161_s7 = sshll.u32 %s300_s3, 4  ;;  %s162_s7 = int_to_ptr.hbm [resolvable:$true] %s161_s7 }
   0x8   :  { %v35_v11 = vrot.slane %v33_v9, 7  ;;  %v27_v13 = vld [vmem:[#allocation2] sm:$0x1]  ;;  %s159_s4 = sshll.u32 %s240_s30, 4  ;;  %s241_s8 = smov 128   ;;  %s160_s4 = int_to_ptr.vmem [resolvable:$true] %s159_s4 }
   0x9   :  { %v36_v14 = vrot.slane %v34_v10, 7  ;;  %v28_v16 = vld [vmem:[#allocation2 + $0x1] sm:$0x1]  ;;  %s242_s9 = smov 8  }
   0xa   :  { %v40_v15 = vsel %vm37_vm1, %v27_v13, %v35_v11 }
   0xb   :  { %v44_v17 = vshrl.u32 %v40_v15, 16  ;;  %v46_v18 = vshll.u32 %v40_v15, 16  ;;  %v62_v19 = vrot.slane %v40_v15, 1  ;;  %v43_v20 = vsel %vm37_vm1, %v28_v16, %v36_v14  ;;  %143 = vmatpush.bf16.msra.mxu0 %v201_v12 }
   0xc   :  { %v52_v22 = vshll.u32 %v43_v20, 16  ;;  %v50_v24 = vshrl.u32 %v43_v20, 16  ;;  %v63_v26 = vrot.slane %v43_v20, 1 }
   0xd   :  { %v48_v21 = vrot.slane %v46_v18, 1  ;;  %64 = vrot.lane.b32.xlu1 %v62_v19, %s238_s21 }
   0xe   :  { %v54_v25 = vrot.slane %v52_v22, 1 }
   0xf   :  { %v49_v23 = vor.u32 %v48_v21, %v44_v17  ;;  %144 = vmatpush.bf16.msra.mxu0 %v200_v28 }
  0x10   :  { %v55_v27 = vor.u32 %v54_v25, %v50_v24 }
  0x11   :  { %56 = vrot.lane.b32.xlu0 %v49_v23, %s239_s22 }
  0x13   :  { %145 = vmatpush.bf16.msra.mxu0 %v199_v29 }
  0x15   :  { %66 = vrot.lane.b32.xlu1 %v63_v26, %s238_s21 }
  0x17   :  { %146 = vmatpush.bf16.msra.mxu0 %v198_v30 }
  0x19   :  { %58 = vrot.lane.b32.xlu0 %v55_v27, %s239_s22 }
  0x7f   :  { %v65_v31 = vpop.permute.xlu1 %64 }
  0x83   :  { %v57_v32 = vpop.permute.xlu0 %56 }
  0x84   :  { %v70_v33 = vsel %vm68_vm2, %v40_v15, %v57_v32 }
  0x85   :  { %v75_v35 = vsel %vm73_vm3, %v70_v33, %v65_v31 }
  0x86   :  { %v96_v39 = vunpack.c.l.b16 %v75_v35 }
  0x87   :  { %v67_v34 = vpop.permute.xlu1 %66 }
  0x8b   :  { %v59_v36 = vpop.permute.xlu0 %58 }
  0x8c   :  { %v72_v37 = vsel %vm68_vm2, %v43_v20, %v59_v36 }
  0x8d   :  { %v77_v38 = vsel %vm73_vm3, %v72_v37, %v67_v34 }
  0x8e   :  { %v97_v40 = vunpack.c.l.b16 %v77_v38 }
  0x90   :  { %v98_v41 = vpack.c.b16 %v97_v40, %v96_v39 }
  0x92   :  { %197 = vmatmul.msk.bf16.vlgmr.msra.gmra.mxu0 %vm135_vm4, %v98_v41 }
 0x10f   :  { %v148_v43 = vpop.f32.mrf.mxu0 }
 0x110   :  { %v149_v44 = vadd.f32 %v210_v42, %v148_v43 }
 0x112   :  { %153 = vst.msk [vmem:[#allocation3] sm:$0xff] %vm68_vm2, %v149_v44 }
 0x117   :  { %v150_v45 = vpop.f32.mrf.mxu0 }
 0x118   :  { %v151_v46 = vadd.f32 %v210_v42, %v150_v45 }
 0x11a   :  { %154 = vst.msk [vmem:[#allocation3 + $0x8] sm:$0xff] %vm68_vm2, %v151_v46 }
 0x11b   :  { %167 = dma.vmem_to_hbm [thread:$0]  %s160_s4, 256, %s162_s7, [#allocation4], %s241_s8, %s241_s8, %s242_s9  }
 0x11c   :  { %235 = dma.done.wait [#allocation4], 256  }
 0x11d   :  { %236 = vsyncadd [#allocation4], 4294967040 }
 0x11e   :  { %172 = vsyncpa [#allocation4], 1 }

</bundles_post_ra>
